<compile_context>
chip_gen: v6e
topology: v6e:2x2x1
jax: 0.10.0
libtpu: 0.0.40
codegen_flags: <defaults>
</compile_context>

<pallas_src>
import functools

import jax
import jax.numpy as jnp
from jax.experimental import pallas as pl
from jax.experimental.pallas import tpu as pltpu


def _simclr_kernel(p_ref, wc_ref, bc_ref, w1_ref, b1_ref, w2_ref, b2_ref,
                   h_ref, z_ref, *, tb, hw):
    """One batch tile.

    p_ref : (tb*hw, K) bf16  dense im2col patches (built in the wrapper)
    wc_ref: (K, F)     bf16  conv weight, im2col row ordering k = tap*C + c
    bc_ref: (1, F)     f32   conv bias
    w1/b1, w2/b2             projection head (bf16 weights, f32 biases)
    h_ref : (tb, F)    f32   encoder features
    z_ref : (tb, P)    f32   projection output
    """
    # ---- encoder stand-in: 3x3 conv as ONE K=9C MXU contraction + bias/ReLU ----
    conv = jnp.dot(p_ref[...], wc_ref[...], preferred_element_type=jnp.float32)
    conv = jnp.maximum(conv + bc_ref[...], 0.0)                   # (tb*hw, F) f32

    # ---- global average pool: sublane reduction over HW (no pool matmul) ----
    f = conv.shape[-1]
    h = jnp.sum(conv.reshape(tb, hw, f), axis=1) * (1.0 / hw)     # (tb, F) f32
    h_ref[...] = h

    # ---- projection head on the whole batch tile: Linear -> ReLU -> Linear ----
    t = jnp.dot(h.astype(w1_ref.dtype), w1_ref[...],
                preferred_element_type=jnp.float32) + b1_ref[...]
    t = jnp.maximum(t, 0.0)
    z_ref[...] = jnp.dot(t.astype(w2_ref.dtype), w2_ref[...],
                         preferred_element_type=jnp.float32) + b2_ref[...]


def simclr_forward(x_nchw, params, *, tb=32):
    """x_nchw: (B, C, H, W) float32.  Returns (h, z) = ((B, F), (B, P)) in f32."""
    wc, bc, w1, b1, w2, b2 = params
    B, C, H, W = x_nchw.shape
    K = 9 * C
    F = wc.shape[1]
    P = w2.shape[1]
    HW = H * W

    # Batch-tile selection: cap at 32 (pool/VMEM growth beyond that), and keep
    # the tiled case 8-aligned so every out block obeys the (8,128) rule.
    tb = max(1, min(tb, 32, B))
    if tb < B:
        tb = max(8, (tb // 8) * 8)
    nb = pl.cdiv(B, tb)
    Bp = nb * tb

    # Host-side glue: NCHW -> NHWC, batch pad, spatial pad for the 3x3 conv,
    # dense im2col (k = tap*C + c, matching wc's row layout), bf16 cast.
    x = jnp.transpose(x_nchw, (0, 2, 3, 1)).astype(jnp.float32)   # (B, H, W, C)
    if Bp != B:
        x = jnp.pad(x, ((0, Bp - B), (0, 0), (0, 0), (0, 0)))
    xp = jnp.pad(x, ((0, 0), (1, 1), (1, 1), (0, 0)))             # (Bp, H+2, W+2, C)
    taps = [xp[:, dy:dy + H, dx:dx + W, :] for dy in range(3) for dx in range(3)]
    patches = jnp.stack(taps, axis=3).reshape(Bp * HW, K).astype(jnp.bfloat16)

    wc_b = wc.astype(jnp.bfloat16)
    w1_b = w1.astype(jnp.bfloat16)
    w2_b = w2.astype(jnp.bfloat16)
    bc_f = bc.astype(jnp.float32)
    b1_f = b1.astype(jnp.float32)
    b2_f = b2.astype(jnp.float32)

    kernel = functools.partial(_simclr_kernel, tb=tb, hw=HW)

    grid_spec = pltpu.PrefetchScalarGridSpec(
        num_scalar_prefetch=0,
        grid=(nb,),
        in_specs=[
            pl.BlockSpec((tb * HW, K), lambda b: (b, 0)),   # im2col patches
            pl.BlockSpec((K, F), lambda b: (0, 0)),         # conv weight
            pl.BlockSpec((1, F), lambda b: (0, 0)),         # conv bias
            pl.BlockSpec((F, F), lambda b: (0, 0)),         # proj W1
            pl.BlockSpec((1, F), lambda b: (0, 0)),         # proj b1
            pl.BlockSpec((F, P), lambda b: (0, 0)),         # proj W2
            pl.BlockSpec((1, P), lambda b: (0, 0)),         # proj b2
        ],
        out_specs=[
            pl.BlockSpec((tb, F), lambda b: (b, 0)),        # h
            pl.BlockSpec((tb, P), lambda b: (b, 0)),        # z
        ],
    )

    h, z = pl.pallas_call(
        kernel,
        out_shape=(
            jax.ShapeDtypeStruct((Bp, F), jnp.float32),
            jax.ShapeDtypeStruct((Bp, P), jnp.float32),
        ),
        grid_spec=grid_spec,
        compiler_params=pltpu.CompilerParams(
            dimension_semantics=("parallel",),
            vmem_limit_bytes=32 * 1024 * 1024),
    )(patches, wc_b, bc_f, w1_b, b1_f, w2_b, b2_f)

    return h[:B], z[:B]


def simclr_reference(x_nchw, params):
    """Pure-JAX reference; mirrors the kernel's bf16 rounding points so the
    comparison stays tight (f32 math otherwise)."""
    wc, bc, w1, b1, w2, b2 = params
    bf = lambda a: a.astype(jnp.bfloat16).astype(jnp.float32)
    B, C, H, W = x_nchw.shape
    x = jnp.transpose(x_nchw, (0, 2, 3, 1))
    xp = jnp.pad(x, ((0, 0), (1, 1), (1, 1), (0, 0)))
    taps = [xp[:, dy:dy + H, dx:dx + W, :] for dy in range(3) for dx in range(3)]
    patches = bf(jnp.stack(taps, axis=3).reshape(B, H * W, C * 9))
    conv = jnp.maximum(patches @ bf(wc) + bc, 0.0)                # (B, HW, F)
    h = jnp.mean(conv, axis=1)                                    # (B, F)
    t = jnp.maximum(bf(h) @ bf(w1) + b1, 0.0)
    z = bf(t) @ bf(w2) + b2
    return h, z


if __name__ == "__main__":
    # Small shapes consistent with the module: batch=2, channels=4, spatial=16,
    # encoder feature_dim=32, projection_dim=128.
    B, C, H, W = 2, 4, 16, 16
    FEATURE_DIM = 32
    PROJECTION_DIM = 128
    K = C * 9

    key = jax.random.PRNGKey(0)
    kx, kwc, kbc, kw1, kb1, kw2, kb2 = jax.random.split(key, 7)

    x = jax.random.normal(kx, (B, C, H, W), dtype=jnp.float32)

    wc = jax.random.normal(kwc, (K, FEATURE_DIM), dtype=jnp.float32) * 0.1
    bc = jax.random.normal(kbc, (1, FEATURE_DIM), dtype=jnp.float32) * 0.1
    w1 = jax.random.normal(kw1, (FEATURE_DIM, FEATURE_DIM), dtype=jnp.float32) * 0.1
    b1 = jax.random.normal(kb1, (1, FEATURE_DIM), dtype=jnp.float32) * 0.1
    w2 = jax.random.normal(kw2, (FEATURE_DIM, PROJECTION_DIM), dtype=jnp.float32) * 0.1
    b2 = jax.random.normal(kb2, (1, PROJECTION_DIM), dtype=jnp.float32) * 0.1
    params = (wc, bc, w1, b1, w2, b2)

    h, z = simclr_forward(x, params)
    jax.block_until_ready((h, z))

    h_ref, z_ref = simclr_reference(x, params)
    assert h.shape == (B, FEATURE_DIM) and z.shape == (B, PROJECTION_DIM)
    assert jnp.allclose(h, h_ref, atol=2e-3, rtol=2e-3)
    assert jnp.allclose(z, z_ref, atol=2e-3, rtol=2e-3)

    print("KERNEL_OK")
</pallas_src>

<mosaic_0001>
module attributes {stable_mosaic.version = 11 : i64} {
  func.func @_simclr_kernel(%arg0: i32, %arg1: memref<512x36xbf16, #tpu.memory_space<vmem>>, %arg2: memref<36x32xbf16, #tpu.memory_space<vmem>>, %arg3: memref<1x32xf32, #tpu.memory_space<vmem>>, %arg4: memref<32x32xbf16, #tpu.memory_space<vmem>>, %arg5: memref<1x32xf32, #tpu.memory_space<vmem>>, %arg6: memref<32x128xbf16, #tpu.memory_space<vmem>>, %arg7: memref<1x128xf32, #tpu.memory_space<vmem>>, %arg8: memref<2x32xf32, #tpu.memory_space<vmem>>, %arg9: memref<2x128xf32, #tpu.memory_space<vmem>>) attributes {dimension_semantics = [#tpu.dimension_semantics<parallel>], iteration_bounds = array<i64: 1>, scalar_prefetch = 0 : i64, scratch_operands = 0 : i64, tpu.core_type = #tpu.core_type<tc>, window_params = [{transform_indices = @transform_0, window_bounds = array<i64: 512, 36>}, {pipeline_mode = #tpu.pipeline_mode<synchronous>, transform_indices = @transform_1, window_bounds = array<i64: 36, 32>}, {pipeline_mode = #tpu.pipeline_mode<synchronous>, transform_indices = @transform_2, window_bounds = array<i64: 1, 32>}, {pipeline_mode = #tpu.pipeline_mode<synchronous>, transform_indices = @transform_3, window_bounds = array<i64: 32, 32>}, {pipeline_mode = #tpu.pipeline_mode<synchronous>, transform_indices = @transform_4, window_bounds = array<i64: 1, 32>}, {pipeline_mode = #tpu.pipeline_mode<synchronous>, transform_indices = @transform_5, window_bounds = array<i64: 32, 128>}, {pipeline_mode = #tpu.pipeline_mode<synchronous>, transform_indices = @transform_6, window_bounds = array<i64: 1, 128>}, {transform_indices = @transform_7, window_bounds = array<i64: 2, 32>}, {transform_indices = @transform_8, window_bounds = array<i64: 2, 128>}]} {
    %c0 = arith.constant 0 : index
    %c0_0 = arith.constant 0 : index
    %0 = vector.load %arg1[%c0, %c0_0] : memref<512x36xbf16, #tpu.memory_space<vmem>>, vector<512x36xbf16>
    %c0_1 = arith.constant 0 : index
    %c0_2 = arith.constant 0 : index
    %1 = vector.load %arg2[%c0_1, %c0_2] : memref<36x32xbf16, #tpu.memory_space<vmem>>, vector<36x32xbf16>
    %cst = arith.constant dense<0.000000e+00> : vector<512x32xf32>
    %2 = tpu.matmul %0, %1, %cst {dimension_numbers = #tpu.dot_dimension_numbers<[1], [0], [0], [1], [0, 0, 1, 1], [], []>} : vector<512x36xbf16>, vector<36x32xbf16>, vector<512x32xf32> -> vector<512x32xf32>
    %c0_3 = arith.constant 0 : index
    %c0_4 = arith.constant 0 : index
    %3 = vector.load %arg3[%c0_3, %c0_4] : memref<1x32xf32, #tpu.memory_space<vmem>>, vector<1x32xf32>
    %4 = vector.broadcast %3 : vector<1x32xf32> to vector<512x32xf32>
    %5 = arith.addf %2, %4 : vector<512x32xf32>
    %cst_5 = arith.constant 0.000000e+00 : f32
    %6 = vector.broadcast %cst_5 : f32 to vector<512x32xf32>
    %7 = arith.maximumf %5, %6 : vector<512x32xf32>
    %8 = vector.shape_cast %7 : vector<512x32xf32> to vector<2x256x32xf32>
    %cst_6 = arith.constant dense<0.000000e+00> : vector<2x32xf32>
    %9 = vector.multi_reduction <add>, %8, %cst_6 [1] : vector<2x256x32xf32> to vector<2x32xf32>
    %cst_7 = arith.constant 3.906250e-03 : f32
    %10 = vector.broadcast %cst_7 : f32 to vector<2x32xf32>
    %11 = arith.mulf %9, %10 : vector<2x32xf32>
    %c0_8 = arith.constant 0 : index
    %c0_9 = arith.constant 0 : index
    %12 = vector.load %arg8[%c0_8, %c0_9] : memref<2x32xf32, #tpu.memory_space<vmem>>, vector<2x32xf32>
    tpu.vector_store %arg8[%c0_8, %c0_9], %11 {strides = array<i32>} : memref<2x32xf32, #tpu.memory_space<vmem>>, vector<2x32xf32>,
    %13 = arith.truncf %11 : vector<2x32xf32> to vector<2x32xbf16>
    %c0_10 = arith.constant 0 : index
    %c0_11 = arith.constant 0 : index
    %14 = vector.load %arg4[%c0_10, %c0_11] : memref<32x32xbf16, #tpu.memory_space<vmem>>, vector<32x32xbf16>
    %cst_12 = arith.constant dense<0.000000e+00> : vector<2x32xf32>
    %15 = tpu.matmul %13, %14, %cst_12 {dimension_numbers = #tpu.dot_dimension_numbers<[1], [0], [0], [1], [0, 0, 1, 1], [], []>} : vector<2x32xbf16>, vector<32x32xbf16>, vector<2x32xf32> -> vector<2x32xf32>
    %c0_13 = arith.constant 0 : index
    %c0_14 = arith.constant 0 : index
    %16 = vector.load %arg5[%c0_13, %c0_14] : memref<1x32xf32, #tpu.memory_space<vmem>>, vector<1x32xf32>
    %17 = vector.broadcast %16 : vector<1x32xf32> to vector<2x32xf32>
    %18 = arith.addf %15, %17 : vector<2x32xf32>
    %cst_15 = arith.constant 0.000000e+00 : f32
    %19 = vector.broadcast %cst_15 : f32 to vector<2x32xf32>
    %20 = arith.maximumf %18, %19 : vector<2x32xf32>
    %21 = arith.truncf %20 : vector<2x32xf32> to vector<2x32xbf16>
    %c0_16 = arith.constant 0 : index
    %c0_17 = arith.constant 0 : index
    %22 = vector.load %arg6[%c0_16, %c0_17] : memref<32x128xbf16, #tpu.memory_space<vmem>>, vector<32x128xbf16>
    %cst_18 = arith.constant dense<0.000000e+00> : vector<2x128xf32>
    %23 = tpu.matmul %21, %22, %cst_18 {dimension_numbers = #tpu.dot_dimension_numbers<[1], [0], [0], [1], [0, 0, 1, 1], [], []>} : vector<2x32xbf16>, vector<32x128xbf16>, vector<2x128xf32> -> vector<2x128xf32>
    %c0_19 = arith.constant 0 : index
    %c0_20 = arith.constant 0 : index
    %24 = vector.load %arg7[%c0_19, %c0_20] : memref<1x128xf32, #tpu.memory_space<vmem>>, vector<1x128xf32>
    %25 = vector.broadcast %24 : vector<1x128xf32> to vector<2x128xf32>
    %26 = arith.addf %23, %25 : vector<2x128xf32>
    %c0_21 = arith.constant 0 : index
    %c0_22 = arith.constant 0 : index
    %27 = vector.load %arg9[%c0_21, %c0_22] : memref<2x128xf32, #tpu.memory_space<vmem>>, vector<2x128xf32>
    tpu.vector_store %arg9[%c0_21, %c0_22], %26 {strides = array<i32>} : memref<2x128xf32, #tpu.memory_space<vmem>>, vector<2x128xf32>,
    return
  }
  func.func @transform_0(%arg0: i32) -> (i32, i32) {
    %c0_i32 = arith.constant 0 : i32
    %c0_i32_0 = arith.constant 0 : i32
    return %arg0, %c0_i32 : i32, i32
  }
  func.func @transform_1(%arg0: i32) -> (i32, i32) {
    %c0_i32 = arith.constant 0 : i32
    %c0_i32_0 = arith.constant 0 : i32
    %c0_i32_1 = arith.constant 0 : i32
    return %c0_i32, %c0_i32_0 : i32, i32
  }
  func.func @transform_2(%arg0: i32) -> (i32, i32) {
    %c0_i32 = arith.constant 0 : i32
    %c0_i32_0 = arith.constant 0 : i32
    %c0_i32_1 = arith.constant 0 : i32
    return %c0_i32, %c0_i32_0 : i32, i32
  }
  func.func @transform_3(%arg0: i32) -> (i32, i32) {
    %c0_i32 = arith.constant 0 : i32
    %c0_i32_0 = arith.constant 0 : i32
    %c0_i32_1 = arith.constant 0 : i32
    return %c0_i32, %c0_i32_0 : i32, i32
  }
  func.func @transform_4(%arg0: i32) -> (i32, i32) {
    %c0_i32 = arith.constant 0 : i32
    %c0_i32_0 = arith.constant 0 : i32
    %c0_i32_1 = arith.constant 0 : i32
    return %c0_i32, %c0_i32_0 : i32, i32
  }
  func.func @transform_5(%arg0: i32) -> (i32, i32) {
    %c0_i32 = arith.constant 0 : i32
    %c0_i32_0 = arith.constant 0 : i32
    %c0_i32_1 = arith.constant 0 : i32
    return %c0_i32, %c0_i32_0 : i32, i32
  }
  func.func @transform_6(%arg0: i32) -> (i32, i32) {
    %c0_i32 = arith.constant 0 : i32
    %c0_i32_0 = arith.constant 0 : i32
    %c0_i32_1 = arith.constant 0 : i32
    return %c0_i32, %c0_i32_0 : i32, i32
  }
  func.func @transform_7(%arg0: i32) -> (i32, i32) {
    %c0_i32 = arith.constant 0 : i32
    %c0_i32_0 = arith.constant 0 : i32
    return %arg0, %c0_i32 : i32, i32
  }
  func.func @transform_8(%arg0: i32) -> (i32, i32) {
    %c0_i32 = arith.constant 0 : i32
    %c0_i32_0 = arith.constant 0 : i32
    return %arg0, %c0_i32 : i32, i32
  }
}

</mosaic_0001>

<bundles_post_ra>
// kernel: tpu_custom_call.1
= control target key start
LH: loop header
LB: loop body
LE: loop exit
PB: predicated region body
PF: predicated region fallthrough
CT: control target
= control target key end

     0   :  { %14 = vsyncpa [#allocation3], 0  ;;  %vm379_vm0 = vcmask 1041408   ;;  %vm282_vm1 = vcmask 293888   ;;  %s1758_s0 = inlined_call_operand.vmem [shape: bf16[512,36], index: 0, kind: input, shape index: {}]   ;;  %s1759_s1 = inlined_call_operand.vmem [shape: bf16[36,32], index: 1, kind: input, shape index: {}]   ;;  %s1760_s2 = inlined_call_operand.vmem [shape: f32[1,32], index: 2, kind: input, shape index: {}]   ;;  %s1761_s3 = inlined_call_operand.vmem [shape: bf16[32,32], index: 3, kind: input, shape index: {}]   ;;  %s1762_s4 = inlined_call_operand.vmem [shape: f32[1,32], index: 4, kind: input, shape index: {}]   ;;  %s1763_s5 = inlined_call_operand.vmem [shape: bf16[32,128], index: 5, kind: input, shape index: {}]   ;;  %s1764_s6 = inlined_call_operand.vmem [shape: f32[1,128], index: 6, kind: input, shape index: {}]   ;;  %s1765_s7 = inlined_call_operand.hbm [shape: f32[2,32], index: 7, kind: output, shape index: {0}]   ;;  %s1766_s8 = inlined_call_operand.hbm [shape: f32[2,128], index: 8, kind: output, shape index: {1}]  }
   0x1   :  { %v1270_v0 = vld [vmem:[%s1759_s1 + $0x10] ss:$0 sps:$4 sm:$0x33]   ;;  %v1271_v1 = vld [vmem:[%s1759_s1 + $0x8] sm:$0xff]   ;;  %v1273_v3 = vld [vmem:[%s1758_s0] sm:$0xff]  }
   0x2   :  { %1264 = vmatprep.subr.msk.bf16.mxu0 %vm379_vm0, %v1270_v0  ;;  %v381_v2 = vsel %vm379_vm0, %v1270_v0, 0  ;;  %1265 = vmatprep.subr.msk.bf16.mxu1 %vm379_vm0, %v1270_v0  ;;  %v1272_v4 = vld [vmem:[%s1759_s1] sm:$0xff]   ;;  %v1274_v5 = vld [vmem:[%s1758_s0 + $0x8] sm:$0xff]   ;;  %v1275_v6 = vld [vmem:[%s1758_s0 + $0x10] sm:$0xff]  }
   0x3   :  { %1173 = vmatpush3.bf16.msra.mxu0 %v381_v2  ;;  %1261 = vmatpush3.bf16.msra.mxu1 %v381_v2  ;;  %v1276_v7 = vld [vmem:[%s1758_s0 + $0x18] sm:$0xff]   ;;  %v1277_v8 = vld [vmem:[%s1758_s0 + $0x20] sm:$0xff]   ;;  %v1291_v9 = vld [vmem:[%s1758_s0 + $0x90] sm:$0xff]  }
   0x4   :  { %1174 = vmatprep.subr.bf16.mxu0 %v1271_v1  ;;  %1259 = vmatprep.subr.bf16.mxu1 %v1271_v1  ;;  %v1292_v10 = vld [vmem:[%s1758_s0 + $0x98] sm:$0xff]   ;;  %v1293_v11 = vld [vmem:[%s1758_s0 + $0xa0] sm:$0xff]   ;;  %v1278_v12 = vld [vmem:[%s1758_s0 + $0x28] sm:$0xff]  }
   0x5   :  { %1178 = vmatprep.mubr.msk.bf16.mxu0 %vm282_vm1, %v1273_v3  ;;  %1214 = vmatprep.mubr.msk.bf16.mxu1 %vm282_vm1, %v1291_v9  ;;  %v1279_v13 = vld [vmem:[%s1758_s0 + $0x30] sm:$0xff]   ;;  %v1294_v14 = vld [vmem:[%s1758_s0 + $0xa8] sm:$0xff]   ;;  %v1280_v16 = vld [vmem:[%s1758_s0 + $0x38] sm:$0xff]  }
   0x6   :  { %v1295_v15 = vld [vmem:[%s1758_s0 + $0xb0] sm:$0xff]   ;;  %v1281_v17 = vld [vmem:[%s1758_s0 + $0x40] sm:$0xff]   ;;  %v1296_v18 = vld [vmem:[%s1758_s0 + $0xb8] sm:$0xff]  }
   0x7   :  { %1175 = vmatpush3.bf16.msra.mxu0 %v1271_v1  ;;  %1262 = vmatpush3.bf16.msra.mxu1 %v1271_v1  ;;  %v1297_v19 = vld [vmem:[%s1758_s0 + $0xc0] sm:$0xff]  }
   0x8   :  { %1176 = vmatprep.subr.bf16.mxu0 %v1272_v4  ;;  %1260 = vmatprep.subr.bf16.mxu1 %v1272_v4 }
   0xb   :  { %1177 = vmatpush3.bf16.msra.mxu0 %v1272_v4  ;;  %1263 = vmatpush3.bf16.msra.mxu1 %v1272_v4 }
   0xe   :  { %1179 = vmatmul.mubr.msk.bf16.vlgmr.msra.gmra.mxu0 %vm282_vm1, %v1274_v5  ;;  %1215 = vmatmul.mubr.msk.bf16.vlgmr.msra.gmra.mxu1 %vm282_vm1, %v1292_v10 }
   0xf   :  { %1182 = vmatprep.mubr.msk.bf16.mxu0 %vm282_vm1, %v1275_v6  ;;  %1218 = vmatprep.mubr.msk.bf16.mxu1 %vm282_vm1, %v1293_v11 }
  0x16   :  { %1183 = vmatmul.mubr.msk.bf16.gmra.mxu0 %vm282_vm1, %v1276_v7  ;;  %1219 = vmatmul.mubr.msk.bf16.gmra.mxu1 %vm282_vm1, %v1294_v14 }
  0x17   :  { %1186 = vmatprep.mubr.msk.bf16.mxu0 %vm282_vm1, %v1277_v8  ;;  %1222 = vmatprep.mubr.msk.bf16.mxu1 %vm282_vm1, %v1295_v15 }
  0x1e   :  { %1187 = vmatmul.mubr.msk.bf16.gmra.mxu0 %vm282_vm1, %v1278_v12 }
  0x1f   :  { %1190 = vmatprep.mubr.msk.bf16.mxu0 %vm282_vm1, %v1279_v13 }
  0x20   :  { %15 = vsyncpa [#allocation5], 0  ;;  %1223 = vmatmul.mubr.msk.bf16.gmra.mxu1 %vm282_vm1, %v1296_v18  ;;  %v1282_v20 = vld [vmem:[%s1758_s0 + $0x48] sm:$0xff]   ;;  %v1283_v21 = vld [vmem:[%s1758_s0 + $0x50] sm:$0xff]   ;;  %v1353_v37 = vmov 0.0   ;;  %vm736_vm2 = vcmask 261120  }
  0x21   :  { %1226 = vmatprep.mubr.msk.bf16.mxu1 %vm282_vm1, %v1297_v19  ;;  %v1298_v22 = vld [vmem:[%s1758_s0 + $0xc8] sm:$0xff]   ;;  %v1299_v23 = vld [vmem:[%s1758_s0 + $0xd0] sm:$0xff]   ;;  %v1284_v24 = vld [vmem:[%s1758_s0 + $0x58] sm:$0xff]   ;;  %1242 = vmatprep.subr.bf16.mxu1 %v1353_v37  ;;  %vm1354_vm3 = vmmov 0   ;;  %vm879_vm4 = vcmask 1041409   ;;  %vm882_vm5 = vcmask 254976  }
  0x22   :  { %v1285_v25 = vld [vmem:[%s1758_s0 + $0x60] sm:$0xff]   ;;  %v1300_v26 = vld [vmem:[%s1758_s0 + $0xd8] sm:$0xff]   ;;  %v1286_v28 = vld [vmem:[%s1758_s0 + $0x68] sm:$0xff]   ;;  %s1355_s15 = smov [#allocation2]  }
  0x23   :  { %v1301_v27 = vld [vmem:[%s1758_s0 + $0xe0] sm:$0xff]   ;;  %v1287_v29 = vld [vmem:[%s1758_s0 + $0x70] sm:$0xff]   ;;  %v1302_v30 = vld [vmem:[%s1758_s0 + $0xe8] sm:$0xff]   ;;  %s1033_s16 = sshll.u32 %s1355_s15, 4  ;;  %s1034_s16 = int_to_ptr.vmem [resolvable:$true] %s1033_s16 }
  0x24   :  { %v1303_v31 = vld [vmem:[%s1758_s0 + $0xf0] sm:$0xff]   ;;  %v1288_v32 = vld [vmem:[%s1758_s0 + $0x78] sm:$0xff]   ;;  %v1289_v33 = vld [vmem:[%s1758_s0 + $0x80] sm:$0xff]   ;;  %s1309_s1 = scalar_lea.vmem %s1034_s16, 32  ;;  %p1314_p1 = scmp.lt.s32.totalorder %s1034_s16, %s1034_s16 }
  0x25   :  { %v1304_v34 = vld [vmem:[%s1758_s0 + $0xf8] sm:$0xff]   ;;  %v1290_v35 = vld [vmem:[%s1758_s0 + $0x88] sm:$0xff]   ;;  %v1547_v39 = vld [vmem:[%s1760_s2] ss:$0 sm:$0xff]  ;;  %p1310_p0 = scmp.ne.s32.totalorder %s1034_s16, %s1309_s1  ;;  %p1315_p2 = scmp.lt.s32.totalorder %s1309_s1, %s1309_s1 }
  0x26   :  { %1191 = vmatmul.mubr.msk.bf16.gmra.mxu0 %vm282_vm1, %v1280_v16  ;;  %v1305_v36 = vld [vmem:[%s1761_s3 + $0x8] sm:$0xff]  }
  0x27   :  { %1194 = vmatprep.mubr.msk.bf16.mxu0 %vm282_vm1, %v1281_v17  ;;  %1243 = vmatpush3.bf16.msra.mxu1 %v1305_v36  ;;  %p1316_p3 = por %p1315_p2, %p1314_p1 }
  0x28   :  { %1227 = vmatmul.mubr.msk.bf16.gmra.mxu1 %vm282_vm1, %v1298_v22  ;;  %1244 = vmatprep.subr.bf16.mxu1 %v1353_v37 }
  0x29   :  { %1230 = vmatprep.mubr.msk.bf16.mxu1 %vm282_vm1, %v1299_v23  ;;  %p1317_p4 = pnand %p1316_p3, %p1310_p0 }
  0x2e   :  { %1195 = vmatmul.mubr.msk.bf16.gmra.mxu0 %vm282_vm1, %v1282_v20 }
  0x2f   :  { %1198 = vmatprep.mubr.msk.bf16.mxu0 %vm282_vm1, %v1283_v21 }
  0x30   :  { %1231 = vmatmul.mubr.msk.bf16.gmra.mxu1 %vm282_vm1, %v1300_v26 }
  0x31   :  { %1234 = vmatprep.mubr.msk.bf16.mxu1 %vm282_vm1, %v1301_v27 }
  0x36   :  { %1199 = vmatmul.mubr.msk.bf16.gmra.mxu0 %vm282_vm1, %v1284_v24 }
  0x37   :  { %1202 = vmatprep.mubr.msk.bf16.mxu0 %vm282_vm1, %v1285_v25 }
  0x38   :  { %1235 = vmatmul.mubr.msk.bf16.gmra.mxu1 %vm282_vm1, %v1302_v30 }
  0x39   :  { %1238 = vmatprep.mubr.msk.bf16.mxu1 %vm282_vm1, %v1303_v31 }
  0x3e   :  { %1203 = vmatmul.mubr.msk.bf16.gmra.mxu0 %vm282_vm1, %v1286_v28 }
  0x3f   :  { %1206 = vmatprep.mubr.msk.bf16.mxu0 %vm282_vm1, %v1287_v29 }
  0x40   :  { %1239 = vmatmul.mubr.msk.bf16.gmra.mxu1 %vm282_vm1, %v1304_v34 }
  0x41   :  { %1246 = vmatprep.mubr.msk.bf16.mxu1 %vm1354_vm3, %v1353_v37 }
  0x46   :  { %1207 = vmatmul.mubr.msk.bf16.gmra.mxu0 %vm282_vm1, %v1288_v32 }
  0x47   :  { %1210 = vmatprep.mubr.msk.bf16.mxu0 %vm282_vm1, %v1289_v33  ;;  %v1306_v33 = vld [vmem:[%s1761_s3] sm:$0xff]  }
  0x48   :  { %1245 = vmatpush3.bf16.msra.mxu1 %v1306_v33 }
  0x49   :  { %1250 = vmatprep.subr.bf16.mxu1 %v1353_v37 }
  0x4e   :  { %1211 = vmatmul.mubr.msk.bf16.gmra.mxu0 %vm282_vm1, %v1290_v35 }
  0xce   :  { %v1180_v38 = vpop.f32.mrf.mxu0  ;;  %v1556_v58 = vpop.f32.mrf.mxu1 }
  0xcf   :  { %v426_v43 = vadd.f32 %v1180_v38, %v1547_v39 }
  0xd0   :  { %v417_v40 = vpop.f32.mrf.mxu0  ;;  %v1563_v5 = vpop.f32.mrf.mxu1 }
  0xd1   :  { %v418_v41 = vadd.f32 %v1547_v39, %v417_v40  ;;  %v674_v49 = vmax.f32 %v426_v43, 0.0 }
  0xd2   :  { %v1181_v42 = vpop.f32.mrf.mxu0  ;;  %v1568_v16 = vpop.f32.mrf.mxu1 }
  0xd3   :  { %v672_v45 = vmax.f32 %v418_v41, 0.0  ;;  %v429_v46 = vadd.f32 %v1181_v42, %v1547_v39  ;;  %v740_v59 = vsel %vm736_vm2, %v674_v49, 0.0 }
  0xd4   :  { %v420_v44 = vpop.f32.mrf.mxu0  ;;  %v1575_v27 = vpop.f32.mrf.mxu1 }
  0xd5   :  { %v421_v47 = vadd.f32 %v1547_v39, %v420_v44  ;;  %v737_v52 = vsel %vm736_vm2, %v672_v45, 0.0  ;;  %v675_v53 = vmax.f32 %v429_v46, 0.0 }
  0xd6   :  { %v1184_v48 = vpop.f32.mrf.mxu0  ;;  %v1585_v41 = vpop.f32.mrf.mxu1 }
  0xd7   :  { %v673_v50 = vmax.f32 %v421_v47, 0.0  ;;  %v442_v60 = vadd.f32 %v1184_v48, %v1547_v39  ;;  %v742_v0 = vsel %vm736_vm2, %v675_v53, 0.0 }
  0xd8   :  { %v433_v51 = vpop.f32.mrf.mxu0 }
  0xd9   :  { %v738_v54 = vsel %vm736_vm2, %v673_v50, 0.0  ;;  %v434_v55 = vadd.f32 %v1547_v39, %v433_v51  ;;  %v678_v6 = vmax.f32 %v442_v60, 0.0 }
  0xda   :  { %v739_v56 = vadd.f32 %v738_v54, %v737_v52  ;;  %v1185_v57 = vpop.f32.mrf.mxu0  ;;  %v1593_v52 = vpop.f32.mrf.mxu1 }
  0xdb   :  { %v676_v61 = vmax.f32 %v434_v55, 0.0  ;;  %v445_v1 = vadd.f32 %v1185_v57, %v1547_v39  ;;  %v748_v17 = vsel %vm736_vm2, %v678_v6, 0.0 }
  0xdc   :  { %v741_v62 = vadd.f32 %v740_v59, %v739_v56  ;;  %v436_v63 = vpop.f32.mrf.mxu0 }
  0xdd   :  { %v437_v2 = vadd.f32 %v1547_v39, %v436_v63  ;;  %v744_v7 = vsel %vm736_vm2, %v676_v61, 0.0  ;;  %v679_v11 = vmax.f32 %v445_v1, 0.0 }
  0xde   :  { %v743_v3 = vadd.f32 %v742_v0, %v741_v62  ;;  %v1188_v4 = vpop.f32.mrf.mxu0  ;;  %v1598_v0 = vpop.f32.mrf.mxu1 }
  0xdf   :  { %v677_v8 = vmax.f32 %v437_v2, 0.0  ;;  %v458_v18 = vadd.f32 %v1188_v4, %v1547_v39  ;;  %v750_v22 = vsel %vm736_vm2, %v679_v11, 0.0 }
  0xe0   :  { %v745_v9 = vadd.f32 %v744_v7, %v743_v3  ;;  %v449_v10 = vpop.f32.mrf.mxu0 }
  0xe1   :  { %v746_v12 = vsel %vm736_vm2, %v677_v8, 0.0  ;;  %v450_v13 = vadd.f32 %v1547_v39, %v449_v10  ;;  %v682_v28 = vmax.f32 %v458_v18, 0.0 }
  0xe2   :  { %v747_v14 = vadd.f32 %v746_v12, %v745_v9  ;;  %v1189_v15 = vpop.f32.mrf.mxu0  ;;  %v1605_v12 = vpop.f32.mrf.mxu1 }
  0xe3   :  { %v680_v19 = vmax.f32 %v450_v13, 0.0  ;;  %v461_v23 = vadd.f32 %v1189_v15, %v1547_v39  ;;  %v756_v42 = vsel %vm736_vm2, %v682_v28, 0.0 }
  0xe4   :  { %v749_v20 = vadd.f32 %v748_v17, %v747_v14  ;;  %v452_v21 = vpop.f32.mrf.mxu0 }
  0xe5   :  { %v453_v24 = vadd.f32 %v1547_v39, %v452_v21  ;;  %v752_v29 = vsel %vm736_vm2, %v680_v19, 0.0  ;;  %v683_v34 = vmax.f32 %v461_v23, 0.0 }
  0xe6   :  { %v751_v25 = vadd.f32 %v750_v22, %v749_v20  ;;  %v1192_v26 = vpop.f32.mrf.mxu0 }
  0xe7   :  { %v681_v30 = vmax.f32 %v453_v24, 0.0  ;;  %v474_v43 = vadd.f32 %v1192_v26, %v1547_v39  ;;  %v758_v47 = vsel %vm736_vm2, %v683_v34, 0.0  ;;  %v1610_v24 = vpop.f32.mrf.mxu1 }
  0xe8   :  { %v753_v31 = vadd.f32 %v752_v29, %v751_v25  ;;  %v465_v32 = vpop.f32.mrf.mxu0 }
  0xe9   :  { %v754_v35 = vsel %vm736_vm2, %v681_v30, 0.0  ;;  %v466_v36 = vadd.f32 %v1547_v39, %v465_v32  ;;  %v686_v53 = vmax.f32 %v474_v43, 0.0 }
  0xea   :  { %v755_v38 = vadd.f32 %v754_v35, %v753_v31  ;;  %v1193_v40 = vpop.f32.mrf.mxu0 }
  0xeb   :  { %v684_v44 = vmax.f32 %v466_v36, 0.0  ;;  %v477_v48 = vadd.f32 %v1193_v40, %v1547_v39  ;;  %v764_v1 = vsel %vm736_vm2, %v686_v53, 0.0  ;;  %v1617_v36 = vpop.f32.mrf.mxu1 }
  0xec   :  { %v757_v45 = vadd.f32 %v756_v42, %v755_v38  ;;  %v468_v46 = vpop.f32.mrf.mxu0 }
  0xed   :  { %v469_v49 = vadd.f32 %v1547_v39, %v468_v46  ;;  %v760_v54 = vsel %vm736_vm2, %v684_v44, 0.0  ;;  %v687_v59 = vmax.f32 %v477_v48, 0.0 }
  0xee   :  { %v759_v50 = vadd.f32 %v758_v47, %v757_v45  ;;  %v1196_v51 = vpop.f32.mrf.mxu0 }
  0xef   :  { %v685_v55 = vmax.f32 %v469_v49, 0.0  ;;  %v490_v2 = vadd.f32 %v1196_v51, %v1547_v39  ;;  %v766_v7 = vsel %vm736_vm2, %v687_v59, 0.0 }
  0xf0   :  { %v761_v56 = vadd.f32 %v760_v54, %v759_v50  ;;  %v481_v57 = vpop.f32.mrf.mxu0  ;;  %v1622_v50 = vpop.f32.mrf.mxu1 }
  0xf1   :  { %v762_v60 = vsel %vm736_vm2, %v685_v55, 0.0  ;;  %v482_v61 = vadd.f32 %v1547_v39, %v481_v57  ;;  %v690_v13 = vmax.f32 %v490_v2, 0.0 }
  0xf2   :  { %v763_v62 = vadd.f32 %v762_v60, %v761_v56  ;;  %v1197_v63 = vpop.f32.mrf.mxu0 }
  0xf3   :  { %v688_v3 = vmax.f32 %v482_v61, 0.0  ;;  %v493_v8 = vadd.f32 %v1197_v63, %v1547_v39  ;;  %v772_v25 = vsel %vm736_vm2, %v690_v13, 0.0  ;;  %v1629_v63 = vpop.f32.mrf.mxu1 }
  0xf4   :  { %v765_v4 = vadd.f32 %v764_v1, %v763_v62  ;;  %v484_v6 = vpop.f32.mrf.mxu0 }
  0xf5   :  { %v485_v9 = vadd.f32 %v1547_v39, %v484_v6  ;;  %v768_v14 = vsel %vm736_vm2, %v688_v3, 0.0  ;;  %v691_v19 = vmax.f32 %v493_v8, 0.0  ;;  %v1634_v13 = vpop.f32.mrf.mxu1 }
  0xf6   :  { %v767_v10 = vadd.f32 %v766_v7, %v765_v4  ;;  %v1200_v11 = vpop.f32.mrf.mxu0 }
  0xf7   :  { %v689_v15 = vmax.f32 %v485_v9, 0.0  ;;  %v506_v26 = vadd.f32 %v1200_v11, %v1547_v39  ;;  %v774_v31 = vsel %vm736_vm2, %v691_v19, 0.0 }
  0xf8   :  { %v769_v17 = vadd.f32 %v768_v14, %v767_v10  ;;  %v497_v18 = vpop.f32.mrf.mxu0 }
  0xf9   :  { %v770_v20 = vsel %vm736_vm2, %v689_v15, 0.0  ;;  %v498_v21 = vadd.f32 %v1547_v39, %v497_v18  ;;  %v694_v38 = vmax.f32 %v506_v26, 0.0  ;;  %v1641_v26 = vpop.f32.mrf.mxu1 }
  0xfa   :  { %v771_v22 = vadd.f32 %v770_v20, %v769_v17  ;;  %v1201_v23 = vpop.f32.mrf.mxu0 }
  0xfb   :  { %v692_v28 = vmax.f32 %v498_v21, 0.0  ;;  %v509_v32 = vadd.f32 %v1201_v23, %v1547_v39  ;;  %v780_v51 = vsel %vm736_vm2, %v694_v38, 0.0 }
  0xfc   :  { %v773_v29 = vadd.f32 %v772_v25, %v771_v22  ;;  %v500_v30 = vpop.f32.mrf.mxu0 }
  0xfd   :  { %v501_v33 = vadd.f32 %v1547_v39, %v500_v30  ;;  %v776_v40 = vsel %vm736_vm2, %v692_v28, 0.0  ;;  %v695_v45 = vmax.f32 %v509_v32, 0.0 }
  0xfe   :  { %v775_v34 = vadd.f32 %v774_v31, %v773_v29  ;;  %v1204_v35 = vpop.f32.mrf.mxu0 }
  0xff   :  { %v693_v42 = vmax.f32 %v501_v33, 0.0  ;;  %v522_v53 = vadd.f32 %v1204_v35, %v1547_v39  ;;  %v782_v57 = vsel %vm736_vm2, %v695_v45, 0.0 }
 0x100   :  { %v777_v43 = vadd.f32 %v776_v40, %v775_v34  ;;  %v513_v44 = vpop.f32.mrf.mxu0 }
 0x101   :  { %v778_v46 = vsel %vm736_vm2, %v693_v42, 0.0  ;;  %v514_v47 = vadd.f32 %v1547_v39, %v513_v44  ;;  %v698_v1 = vmax.f32 %v522_v53, 0.0  ;;  %v1646_v42 = vpop.f32.mrf.mxu1 }
 0x102   :  { %v779_v48 = vadd.f32 %v778_v46, %v777_v43  ;;  %v1205_v49 = vpop.f32.mrf.mxu0 }
 0x103   :  { %v696_v54 = vmax.f32 %v514_v47, 0.0  ;;  %v525_v59 = vadd.f32 %v1205_v49, %v1547_v39  ;;  %v788_v14 = vsel %vm736_vm2, %v698_v1, 0.0 }
 0x104   :  { %v781_v55 = vadd.f32 %v780_v51, %v779_v48  ;;  %v516_v56 = vpop.f32.mrf.mxu0 }
 0x105   :  { %v517_v60 = vadd.f32 %v1547_v39, %v516_v56  ;;  %v784_v2 = vsel %vm736_vm2, %v696_v54, 0.0  ;;  %v699_v7 = vmax.f32 %v525_v59, 0.0  ;;  %v612_v54 = vpop.f32.mrf.mxu1  ;;  %v562_v56 = vadd.f32 %v1547_v39, %v1563_v5 }
 0x106   :  { %v783_v61 = vadd.f32 %v782_v57, %v781_v55  ;;  %v1208_v62 = vpop.f32.mrf.mxu0 }
 0x107   :  { %v697_v3 = vmax.f32 %v517_v60, 0.0  ;;  %v538_v15 = vadd.f32 %v1208_v62, %v1547_v39  ;;  %v790_v20 = vsel %vm736_vm2, %v699_v7, 0.0  ;;  %v565_v62 = vadd.f32 %v1547_v39, %v1575_v27 }
 0x108   :  { %v785_v4 = vadd.f32 %v784_v2, %v783_v61  ;;  %v529_v6 = vpop.f32.mrf.mxu0  ;;  %v1661_v2 = vpop.f32.mrf.mxu1 }
 0x109   :  { %v786_v8 = vsel %vm736_vm2, %v697_v3, 0.0  ;;  %v530_v9 = vadd.f32 %v1547_v39, %v529_v6  ;;  %v702_v28 = vmax.f32 %v538_v15, 0.0  ;;  %v708_v6 = vmax.f32 %v562_v56, 0.0 }
 0x10a   :  { %v787_v10 = vadd.f32 %v786_v8, %v785_v4  ;;  %v1209_v11 = vpop.f32.mrf.mxu0  ;;  %v570_v4 = vadd.f32 %v1556_v58, %v1547_v39  ;;  %v573_v8 = vadd.f32 %v1568_v16, %v1547_v39  ;;  %v578_v15 = vadd.f32 %v1547_v39, %v1593_v52 }
 0x10b   :  { %v700_v17 = vmax.f32 %v530_v9, 0.0  ;;  %v541_v21 = vadd.f32 %v1209_v11, %v1547_v39  ;;  %v796_v43 = vsel %vm736_vm2, %v702_v28, 0.0  ;;  %v709_v9 = vmax.f32 %v565_v62, 0.0  ;;  %v625_v11 = vpop.f32.mrf.mxu1 }
 0x10c   :  { %v789_v18 = vadd.f32 %v788_v14, %v787_v10  ;;  %v532_v19 = vpop.f32.mrf.mxu0  ;;  %v710_v14 = vmax.f32 %v570_v4, 0.0  ;;  %v813_v27 = vsel %vm736_vm2, %v708_v6, 0.0  ;;  %v589_v52 = vadd.f32 %v1598_v0, %v1547_v39 }
 0x10d   :  { %v533_v22 = vadd.f32 %v1547_v39, %v532_v19  ;;  %v792_v29 = vsel %vm736_vm2, %v700_v17, 0.0  ;;  %v703_v33 = vmax.f32 %v541_v21, 0.0  ;;  %v815_v58 = vsel %vm736_vm2, %v709_v9, 0.0  ;;  %v1233_v21 = vpop.f32.mrf.mxu1 }
 0x10e   :  { %v791_v23 = vadd.f32 %v790_v20, %v789_v18  ;;  %v1212_v25 = vpop.f32.mrf.mxu0  ;;  %v711_v18 = vmax.f32 %v573_v8, 0.0  ;;  %v581_v19 = vadd.f32 %v1547_v39, %v1605_v12  ;;  %v817_v16 = vsel %vm736_vm2, %v710_v14, 0.0 }
 0x10f   :  { %v701_v30 = vmax.f32 %v533_v22, 0.0  ;;  %v554_v44 = vadd.f32 %v1212_v25, %v1547_v39  ;;  %v798_v47 = vsel %vm736_vm2, %v703_v33, 0.0  ;;  %v586_v22 = vadd.f32 %v1585_v41, %v1547_v39 }
 0x110   :  { %v793_v31 = vadd.f32 %v792_v29, %v791_v23  ;;  %v545_v32 = vpop.f32.mrf.mxu0  ;;  %v712_v23 = vmax.f32 %v578_v15, 0.0  ;;  %v819_v28 = vsel %vm736_vm2, %v711_v18, 0.0  ;;  %v713_v29 = vmax.f32 %v581_v19, 0.0 }
 0x111   :  { %v794_v34 = vsel %vm736_vm2, %v701_v30, 0.0  ;;  %v546_v35 = vadd.f32 %v1547_v39, %v545_v32  ;;  %v706_v55 = vmax.f32 %v554_v44, 0.0  ;;  %v714_v32 = vmax.f32 %v586_v22, 0.0 }
 0x112   :  { %v795_v38 = vadd.f32 %v794_v34, %v793_v31  ;;  %v1213_v40 = vpop.f32.mrf.mxu0  ;;  %v628_v31 = vpop.f32.mrf.mxu1  ;;  %v821_v12 = vsel %vm736_vm2, %v712_v23, 0.0  ;;  %v594_v33 = vadd.f32 %v1547_v39, %v1617_v36  ;;  %v823_v41 = vsel %vm736_vm2, %v713_v29, 0.0 }
 0x113   :  { %v704_v48 = vmax.f32 %v546_v35, 0.0  ;;  %v557_v49 = vadd.f32 %v1213_v40, %v1547_v39  ;;  %v809_v3 = vsel %vm736_vm2, %v706_v55, 0.0  ;;  %v715_v35 = vmax.f32 %v589_v52, 0.0 }
 0x114   :  { %v797_v45 = vadd.f32 %v796_v43, %v795_v38  ;;  %v548_v46 = vpop.f32.mrf.mxu0  ;;  %v597_v38 = vadd.f32 %v1547_v39, %v1629_v63  ;;  %v1236_v43 = vpop.f32.mrf.mxu1  ;;  %v825_v0 = vsel %vm736_vm2, %v714_v32, 0.0  ;;  %v602_v44 = vadd.f32 %v1610_v24, %v1547_v39 }
 0x115   :  { %v549_v51 = vadd.f32 %v1547_v39, %v548_v46  ;;  %v806_v59 = vsel %vm736_vm2, %v704_v48, 0.0  ;;  %v707_v60 = vmax.f32 %v557_v49, 0.0  ;;  %v605_v36 = vadd.f32 %v1622_v50, %v1547_v39 }
 0x116   :  { %v1653_v53 = vadd.f32 %v798_v47, %v797_v45  ;;  %v716_v45 = vmax.f32 %v594_v33, 0.0  ;;  %v827_v47 = vsel %vm736_vm2, %v715_v35, 0.0  ;;  %v717_v48 = vmax.f32 %v597_v38, 0.0 }
 0x117   :  { %v705_v57 = vmax.f32 %v549_v51, 0.0  ;;  %v811_v5 = vsel %vm736_vm2, %v707_v60, 0.0  ;;  %v641_v51 = vpop.f32.mrf.mxu1  ;;  %v718_v55 = vmax.f32 %v602_v44, 0.0  ;;  %v610_v56 = vadd.f32 %v1547_v39, %v1641_v26 }
 0x118   :  { %v829_v63 = vsel %vm736_vm2, %v716_v45, 0.0  ;;  %v831_v24 = vsel %vm736_vm2, %v717_v48, 0.0  ;;  %v613_v60 = vadd.f32 %v1547_v39, %v612_v54  ;;  %v618_v50 = vadd.f32 %v1634_v13, %v1547_v39 }
 0x119   :  { %v807_v61 = vsel %vm736_vm2, %v705_v57, 0.0  ;;  %v1237_v62 = vpop.f32.mrf.mxu1  ;;  %v621_v26 = vadd.f32 %v1646_v42, %v1547_v39  ;;  %v629_v13 = vadd.f32 %v1547_v39, %v628_v31  ;;  %v634_v42 = vadd.f32 %v1661_v2, %v1547_v39 }
 0x11a   :  { %v808_v1 = vadd.f32 %v807_v61, %v806_v59  ;;  %v719_v59 = vmax.f32 %v605_v36, 0.0  ;;  %v722_v9 = vmax.f32 %v618_v50, 0.0  ;;  %v637_v22 = vadd.f32 %v1233_v21, %v1547_v39 }
 0x11b   :  { %v644_v8 = vpop.f32.mrf.mxu1  ;;  %v642_v29 = vadd.f32 %v1547_v39, %v641_v51  ;;  %v650_v21 = vadd.f32 %v1236_v43, %v1547_v39  ;;  %v800_v48 = vrot.slane %v1653_v53, 4 }
 0x11c   :  { %v810_v7 = vadd.f32 %v809_v3, %v808_v1  ;;  %v833_v1 = vsel %vm736_vm2, %v718_v55, 0.0  ;;  %v720_v3 = vmax.f32 %v610_v56, 0.0  ;;  %v835_v6 = vsel %vm736_vm2, %v719_v59, 0.0 }
 0x11d   :  { %v1240_v18 = vpop.f32.mrf.mxu1  ;;  %v727_v31 = vmax.f32 %v637_v22, 0.0  ;;  %v645_v2 = vadd.f32 %v1547_v39, %v644_v8  ;;  %v728_v35 = vmax.f32 %v642_v29, 0.0 }
 0x11e   :  { %v812_v10 = vadd.f32 %v811_v5, %v810_v7  ;;  %v721_v7 = vmax.f32 %v613_v60, 0.0  ;;  %v837_v54 = vsel %vm736_vm2, %v720_v3, 0.0 }
 0x11f   :  { %v851_v38 = vsel %vm736_vm2, %v727_v31, 0.0  ;;  %v1123_v31 = vld [vmem:[%s1762_s4] ss:$0 sm:$0xff] }
 0x120   :  { %v814_v17 = vadd.f32 %v813_v27, %v812_v10  ;;  %v626_v10 = vadd.f32 %v1547_v39, %v625_v11  ;;  %v723_v27 = vmax.f32 %v621_v26, 0.0  ;;  %v839_v15 = vsel %vm736_vm2, %v721_v7, 0.0 }
 0x121   :  { %v725_v11 = vmax.f32 %v629_v13, 0.0 }
 0x122   :  { %v816_v20 = vadd.f32 %v815_v58, %v814_v17  ;;  %v841_v58 = vsel %vm736_vm2, %v722_v9, 0.0  ;;  %v724_v19 = vmax.f32 %v626_v10, 0.0 }
 0x123   :  { %v847_v32 = vsel %vm736_vm2, %v725_v11, 0.0 }
 0x124   :  { %v818_v25 = vadd.f32 %v817_v16, %v816_v20  ;;  %v843_v16 = vsel %vm736_vm2, %v723_v27, 0.0  ;;  %v845_v52 = vsel %vm736_vm2, %v724_v19, 0.0 }
 0x126   :  { %v820_v30 = vadd.f32 %v819_v28, %v818_v25  ;;  %v657_v25 = vpop.f32.mrf.mxu1  ;;  %v726_v28 = vmax.f32 %v634_v42, 0.0 }
 0x127   :  { %v658_v36 = vadd.f32 %v1547_v39, %v657_v25 }
 0x128   :  { %v822_v34 = vadd.f32 %v821_v12, %v820_v30  ;;  %v1241_v33 = vpop.f32.mrf.mxu1 }
 0x129   :  { %v732_v59 = vmax.f32 %v658_v36, 0.0 }
 0x12a   :  { %v824_v40 = vadd.f32 %v823_v41, %v822_v34  ;;  %v849_v34 = vsel %vm736_vm2, %v726_v28, 0.0  ;;  %v660_v45 = vpop.f32.mrf.mxu1 }
 0x12b   :  { %v661_v55 = vadd.f32 %v1547_v39, %v660_v45 }
 0x12c   :  { %v826_v46 = vadd.f32 %v825_v0, %v824_v40  ;;  %v653_v40 = vadd.f32 %v1237_v62, %v1547_v39  ;;  %v729_v0 = vmax.f32 %v645_v2, 0.0  ;;  %v669_v62 = vadd.f32 %v1241_v33, %v1547_v39 }
 0x12e   :  { %v828_v49 = vadd.f32 %v827_v47, %v826_v46  ;;  %v730_v46 = vmax.f32 %v650_v21, 0.0  ;;  %v853_v47 = vsel %vm736_vm2, %v728_v35, 0.0  ;;  %v731_v51 = vmax.f32 %v653_v40, 0.0 }
 0x12f   :  { %v855_v43 = vsel %vm736_vm2, %v729_v0, 0.0  ;;  %v735_v7 = vmax.f32 %v669_v62, 0.0 }
 0x130   :  { %v830_v57 = vadd.f32 %v829_v63, %v828_v49  ;;  %v857_v56 = vsel %vm736_vm2, %v730_v46, 0.0 }
 0x131   :  { %v867_v10 = vsel %vm736_vm2, %v735_v7, 0.0 }
 0x132   :  { %v832_v61 = vadd.f32 %v831_v24, %v830_v57  ;;  %v666_v57 = vadd.f32 %v1240_v18, %v1547_v39  ;;  %v801_v24 = vadd.f32 %v800_v48, %v1653_v53 }
 0x134   :  { %v834_v4 = vadd.f32 %v833_v1, %v832_v61  ;;  %v859_v61 = vsel %vm736_vm2, %v731_v51, 0.0  ;;  %v733_v1 = vmax.f32 %v661_v55, 0.0  ;;  %v734_v3 = vmax.f32 %v666_v57, 0.0 }
 0x136   :  { %v836_v5 = vadd.f32 %v835_v6, %v834_v4  ;;  %v861_v4 = vsel %vm736_vm2, %v732_v59, 0.0  ;;  %v802_v6 = vrot.slane %v801_v24, 2  ;;  %v865_v9 = vsel %vm736_vm2, %v734_v3, 0.0 }
 0x138   :  { %v838_v14 = vadd.f32 %v837_v54, %v836_v5  ;;  %v863_v5 = vsel %vm736_vm2, %v733_v1, 0.0  ;;  %v803_v54 = vadd.f32 %v802_v6, %v801_v24 }
 0x13a   :  { %v840_v17 = vadd.f32 %v839_v15, %v838_v14  ;;  %v804_v27 = vrot.slane %v803_v54, 1 }
 0x13c   :  { %v842_v20 = vadd.f32 %v841_v58, %v840_v17  ;;  %v805_v13 = vadd.f32 %v804_v27, %v803_v54 }
 0x13e   :  { %v844_v23 = vadd.f32 %v843_v16, %v842_v20  ;;  %v875_v58 = vmul.f32 0.00390625, %v805_v13 }
 0x140   :  { %v846_v30 = vadd.f32 %v845_v52, %v844_v23  ;;  %v884_v20 = vpack.c.bf16 %v875_v58, %v875_v58  ;;  %v1307_v52 = vld [vmem:[%s1763_s5 + $0x8] sm:$0xff]  }
 0x142   :  { %v848_v12 = vadd.f32 %v847_v32, %v846_v30  ;;  %v899_v23 = vunpack.c.l.b16 %v884_v20  ;;  %v1308_v30 = vld [vmem:[%s1763_s5] sm:$0xff]  }
 0x144   :  { %v850_v41 = vadd.f32 %v849_v34, %v848_v12 }
 0x146   :  { %v852_v44 = vadd.f32 %v851_v38, %v850_v41 }
 0x148   :  { %v854_v49 = vadd.f32 %v853_v47, %v852_v44 }
 0x14a   :  { %v856_v63 = vadd.f32 %v855_v43, %v854_v49 }
 0x14c   :  { %v858_v60 = vadd.f32 %v857_v56, %v856_v63 }
 0x14e   :  { %v860_v50 = vadd.f32 %v859_v61, %v858_v60 }
 0x150   :  { %v862_v26 = vadd.f32 %v861_v4, %v860_v50 }
 0x152   :  { %v864_v8 = vadd.f32 %v863_v5, %v862_v26 }
 0x154   :  { %v866_v53 = vadd.f32 %v865_v9, %v864_v8 }
 0x156   :  { %v868_v14 = vadd.f32 %v867_v10, %v866_v53 }
 0x158   :  { %v869_v39 = vrot.slane %v868_v14, 4 }
 0x15a   :  { %v870_v15 = vadd.f32 %v869_v39, %v868_v14 }
 0x15c   :  { %v871_v17 = vrot.slane %v870_v15, 2 }
 0x15e   :  { %v872_v18 = vadd.f32 %v871_v17, %v870_v15 }
 0x160   :  { %v873_v42 = vrot.slane %v872_v18, 1 }
 0x162   :  { %v874_v19 = vadd.f32 %v873_v42, %v872_v18 }
 0x164   :  { %v876_v16 = vmul.f32 0.00390625, %v874_v19 }
 0x166   :  { %v885_v22 = vpack.c.bf16 %v876_v16, %v876_v16  ;;  %v880_v11 = vsel %vm879_vm4, %v876_v16, %v875_v58 }
 0x167   :  { %883 = vst.msk [vmem:[#allocation2] sm:$0x3] %vm882_vm5, %v880_v11 }
 0x168   :  { %v900_v25 = vunpack.c.l.b16 %v885_v22 }
 0x16a   :  { %v901_v28 = vsel %vm879_vm4, %v900_v25, %v899_v23 }
 0x16b   :  { %v902_v29 = vpack.c.b16 %v901_v28, %v901_v28 }
 0x16d   :  { %1247 = vmatmul.mubr.msk.bf16.vlgmr.msra.gmra.mxu1 %vm736_vm2, %v902_v29 }
 0x16e   :  { %1251 = vmatpush3.bf16.msra.mxu1 %v1307_v52  ;;  %1254 = vmatprep.mubr.msk.bf16.mxu1 %vm1354_vm3, %v1353_v37 }
 0x16f   :  { %1252 = vmatprep.subr.bf16.mxu1 %v1353_v37 }
 0x172   :  { %1253 = vmatpush3.bf16.msra.mxu1 %v1308_v30 }
 0x22d   :  { %v952_v32 = vpop.f32.mrf.mxu1 }
 0x22e   :  { %v953_v2 = vadd.f32 %v1123_v31, %v952_v32 }
 0x22f   :  { %v1248_v12 = vpop.f32.mrf.mxu1 }
 0x230   :  { %v958_v33 = vmax.f32 %v953_v2, 0.0 }
 0x231   :  { %v955_v34 = vpop.f32.mrf.mxu1 }
 0x232   :  { %v959_v21 = vpack.c.bf16 %v958_v33, %v958_v33 }
 0x233   :  { %v1249_v35 = vpop.f32.mrf.mxu1 }
 0x234   :  { %1255 = vmatmul.mubr.msk.bf16.vlgmr.msra.gmra.mxu1 %vm736_vm2, %v959_v21 }
 0x235   :  { %1320 = shalt.err (!%p1317_p4)
}
 0x236   :  { %1036 = dma.vmem_to_hbm [thread:$0]  %s1034_s16, 32, %s1765_s7, [#allocation3]   ;;  %v1127_v37 = vld [vmem:[%s1764_s6] ss:$0 sm:$0xff] }
 0x237   :  { %s1356_s19 = smov [#allocation4]  }
 0x238   :  { %s1043_s20 = sshll.u32 %s1356_s19, 4  ;;  %s1044_s20 = int_to_ptr.vmem [resolvable:$true] %s1043_s20 }
 0x239   :  { %s1329_s21 = scalar_lea.vmem %s1044_s20, 32  ;;  %p1334_p6 = scmp.lt.s32.totalorder %s1044_s20, %s1044_s20 }
 0x23a   :  { %p1330_p5 = scmp.ne.s32.totalorder %s1044_s20, %s1329_s21  ;;  %p1335_p7 = scmp.lt.s32.totalorder %s1329_s21, %s1329_s21 }
 0x23c   :  { %p1336_p8 = por %p1335_p7, %p1334_p6 }
 0x23e   :  { %p1337_p9 = pnand %p1336_p8, %p1330_p5 }
 0x2f4   :  { %v1020_v41 = vpop.f32.mrf.mxu1 }
 0x2f5   :  { %v1021_v38 = vadd.f32 %v1127_v37, %v1020_v41 }
 0x2f6   :  { %v1256_v40 = vpop.f32.mrf.mxu1 }
 0x2f7   :  { %1026 = vst [vmem:[#allocation4] sm:$0x3] %v1021_v38 }
 0x2f8   :  { %v1023_v0 = vpop.f32.mrf.mxu1 }
 0x2f9   :  { %1340 = shalt.err (!%p1337_p9)
}
 0x2fa   :  { %1046 = dma.vmem_to_hbm [thread:$0]  %s1044_s20, 32, %s1766_s8, [#allocation5]   ;;  %v1257_v44 = vpop.f32.mrf.mxu1 }
 0x2fb   :  { %1349 = dma.done.wait [#allocation3], 32  }
 0x2fc   :  { %1350 = vsyncadd [#allocation3], 4294967264 }
 0x2fd   :  { %1351 = dma.done.wait [#allocation5], 32  }
 0x2fe   :  { %1352 = vsyncadd [#allocation5], 4294967264 }
 0x2ff   :  { %1053 = vsyncpa [#allocation3], 1 }
 0x300   :  { %1054 = vsyncpa [#allocation5], 1 }

</bundles_post_ra>
